<compile_context>
chip_gen: v7x
topology: tpu7x:2x2x1
jax: 0.10.0
libtpu: 0.0.40
codegen_flags: <defaults>
</compile_context>

<pallas_src>
import functools

import jax
import jax.numpy as jnp
from jax.experimental import pallas as pl
from jax.experimental.pallas import tpu as pltpu


def _residual_kernel(seed_ref, x_ref, w_ref, b_ref, alpha_ref, beta_ref, o_ref,
                     *, eps: float, dropout_p: float, training: bool):
    # ---- load tile -------------------------------------------------------
    x = x_ref[...].astype(jnp.float32)                     # (TM, F)
    TM, F = x.shape

    # ---- LayerNormalization (torch semantics: unbiased std, eps on std) ---
    mean = jnp.mean(x, axis=-1, keepdims=True)              # (TM, 1)
    centered = x - mean
    var_unbiased = jnp.sum(centered * centered, axis=-1, keepdims=True) / (F - 1)
    std = jnp.sqrt(var_unbiased)
    inv = 1.0 / (std + eps)                                  # (TM, 1): one divide per row
    normed = (centered * inv) * alpha_ref[...] + beta_ref[...]

    # ---- sublayer: Linear(F -> F) on the MXU (bf16 operands, f32 acc) ------
    y = jnp.dot(normed.astype(jnp.bfloat16), w_ref[...],
                preferred_element_type=jnp.float32)
    y = y + b_ref[...]

    # ---- dropout (inverted dropout; identity in eval mode) -----------------
    if training and dropout_p > 0.0:
        # Counter-based hash RNG (portable: plain elementwise uint32 ops).
        row = jax.lax.broadcasted_iota(jnp.int32, (TM, F), 0)
        col = jax.lax.broadcasted_iota(jnp.int32, (TM, F), 1)
        ctr = ((pl.program_id(0) * TM + row) * F + col).astype(jnp.uint32)
        s = seed_ref[0].astype(jnp.uint32)
        z = ctr + s * jnp.uint32(0x9E3779B9)
        z = (z ^ (z >> 16)) * jnp.uint32(0x85EBCA6B)
        z = (z ^ (z >> 13)) * jnp.uint32(0xC2B2AE35)
        z = z ^ (z >> 16)
        # Exact integer keep-threshold: P(drop) = thr / 2^32 == dropout_p.
        thr = max(0, min(int(dropout_p * 4294967296.0), 4294967295))
        keep = z >= jnp.uint32(thr)
        y = jnp.where(keep, y * (1.0 / (1.0 - dropout_p)), 0.0)

    # ---- residual add ------------------------------------------------------
    o_ref[...] = (x + y).astype(o_ref.dtype)


def residual_connection(x, w, b, alpha, beta, *, eps=1e-6, dropout_p=0.1,
                        training=False, seed=0, tile_rows=256):
    """x: (B, S, F).  Returns x + dropout(LayerNorm(x) @ w + b)."""
    B, S, F = x.shape
    R = B * S

    # Row tiling: multiple of 8 (sublane), no larger than the (padded) row count.
    tile_rows = max(8, (tile_rows // 8) * 8)
    tile_rows = min(tile_rows, ((R + 7) // 8) * 8)
    n_tiles = pl.cdiv(R, tile_rows)
    R_pad = n_tiles * tile_rows

    x2 = x.reshape(R, F)
    if R_pad != R:
        x2 = jnp.pad(x2, ((0, R_pad - R), (0, 0)))   # zero rows normalize to 0 (no NaN)

    w_bf16 = w.astype(jnp.bfloat16)                   # bf16 MXU operand, half VMEM
    b2 = b.reshape(1, F).astype(jnp.float32)
    alpha2 = alpha.reshape(1, F).astype(jnp.float32)
    beta2 = beta.reshape(1, F).astype(jnp.float32)
    seed_arr = jnp.asarray([seed], dtype=jnp.int32)

    # VMEM budget: double-buffered x/out tiles + (double-buffered) W + params.
    tile_bytes = tile_rows * F * 4
    needed = 4 * tile_bytes + 2 * (F * F * 2) + 8 * F * 4 + (2 << 20)
    vmem_limit = int(min(max(needed, 32 * 1024 * 1024), 64 * 1024 * 1024))

    kernel = functools.partial(_residual_kernel, eps=eps, dropout_p=dropout_p,
                               training=training)

    out = pl.pallas_call(
        kernel,
        out_shape=jax.ShapeDtypeStruct((R_pad, F), x.dtype),
        grid=(n_tiles,),
        in_specs=[
            pl.BlockSpec(memory_space=pltpu.MemorySpace.SMEM),        # seed
            pl.BlockSpec((tile_rows, F), lambda i: (i, 0)),           # x rows
            pl.BlockSpec((F, F), lambda i: (0, 0)),                   # W (bf16)
            pl.BlockSpec((1, F), lambda i: (0, 0)),                   # bias
            pl.BlockSpec((1, F), lambda i: (0, 0)),                   # alpha
            pl.BlockSpec((1, F), lambda i: (0, 0)),                   # beta
        ],
        out_specs=pl.BlockSpec((tile_rows, F), lambda i: (i, 0)),
        compiler_params=pltpu.CompilerParams(
            dimension_semantics=("parallel",),        # independent row tiles -> megacore
            vmem_limit_bytes=vmem_limit),
    )(seed_arr, x2, w_bf16, b2, alpha2, beta2)

    return out[:R].reshape(B, S, F)


def residual_connection_ref(x, w, b, alpha, beta, *, eps=1e-6):
    """Pure-JAX reference (eval mode, dropout = identity), same bf16 matmul."""
    x32 = x.astype(jnp.float32)
    F = x32.shape[-1]
    mean = jnp.mean(x32, axis=-1, keepdims=True)
    centered = x32 - mean
    var_unbiased = jnp.sum(centered * centered, axis=-1, keepdims=True) / (F - 1)
    std = jnp.sqrt(var_unbiased)
    inv = 1.0 / (std + eps)
    normed = (centered * inv) * alpha + beta
    y = jnp.einsum("bsf,fg->bsg", normed.astype(jnp.bfloat16), w.astype(jnp.bfloat16),
                   preferred_element_type=jnp.float32) + b
    return (x32 + y).astype(x.dtype)


if __name__ == "__main__":
    # Small shapes; F is a multiple of 128 so the feature axis is lane-dense.
    B, S, F = 2, 8, 128

    key = jax.random.PRNGKey(0)
    kx, kw, kb = jax.random.split(key, 3)

    x = jax.random.normal(kx, (B, S, F), dtype=jnp.float32)

    # Deterministic "sublayer" parameters (Linear F->F).
    w = jax.random.normal(kw, (F, F), dtype=jnp.float32) * 0.05
    b = jax.random.normal(kb, (F,), dtype=jnp.float32) * 0.01

    # LayerNormalization parameters, as in __init__: alpha=ones, beta=zeros.
    alpha = jnp.ones((F,), dtype=jnp.float32)
    beta = jnp.zeros((F,), dtype=jnp.float32)

    # Eval-mode run (dropout = identity) — verified against pure-JAX reference.
    out = residual_connection(x, w, b, alpha, beta, dropout_p=0.1,
                              training=False, seed=0)
    out = jax.block_until_ready(out)

    ref = residual_connection_ref(x, w, b, alpha, beta)
    assert jnp.allclose(out, ref, atol=1e-3, rtol=1e-3), "mismatch vs reference"

    # Training-mode run (in-kernel counter-hash dropout) — exercise the path.
    out_train = residual_connection(x, w, b, alpha, beta, dropout_p=0.1,
                                    training=True, seed=123)
    out_train = jax.block_until_ready(out_train)
    assert bool(jnp.all(jnp.isfinite(out_train)))

    print("KERNEL_OK")
</pallas_src>

<mosaic_0001>
module attributes {stable_mosaic.version = 11 : i64} {
  func.func @_residual_kernel(%arg0: i32, %arg1: memref<1xi32, #tpu.memory_space<smem>>, %arg2: memref<16x128xf32, #tpu.memory_space<vmem>>, %arg3: memref<128x128xbf16, #tpu.memory_space<vmem>>, %arg4: memref<1x128xf32, #tpu.memory_space<vmem>>, %arg5: memref<1x128xf32, #tpu.memory_space<vmem>>, %arg6: memref<1x128xf32, #tpu.memory_space<vmem>>, %arg7: memref<16x128xf32, #tpu.memory_space<vmem>>) attributes {dimension_semantics = [#tpu.dimension_semantics<parallel>], iteration_bounds = array<i64: 1>, scalar_prefetch = 0 : i64, scratch_operands = 0 : i64, tpu.core_type = #tpu.core_type<tc>, window_params = [{transform_indices = @transform_0, window_bounds = array<i64: 1>}, {transform_indices = @transform_1, window_bounds = array<i64: 16, 128>}, {pipeline_mode = #tpu.pipeline_mode<synchronous>, transform_indices = @transform_2, window_bounds = array<i64: 128, 128>}, {pipeline_mode = #tpu.pipeline_mode<synchronous>, transform_indices = @transform_3, window_bounds = array<i64: 1, 128>}, {pipeline_mode = #tpu.pipeline_mode<synchronous>, transform_indices = @transform_4, window_bounds = array<i64: 1, 128>}, {pipeline_mode = #tpu.pipeline_mode<synchronous>, transform_indices = @transform_5, window_bounds = array<i64: 1, 128>}, {transform_indices = @transform_6, window_bounds = array<i64: 16, 128>}]} {
    %c0 = arith.constant 0 : index
    %c0_0 = arith.constant 0 : index
    %0 = vector.load %arg2[%c0, %c0_0] : memref<16x128xf32, #tpu.memory_space<vmem>>, vector<16x128xf32>
    %cst = arith.constant dense<0.000000e+00> : vector<16xf32>
    %1 = vector.multi_reduction <add>, %0, %cst [1] : vector<16x128xf32> to vector<16xf32>
    %2 = vector.shape_cast %1 : vector<16xf32> to vector<16x1xf32>
    %cst_1 = arith.constant 1.280000e+02 : f32
    %3 = vector.broadcast %cst_1 : f32 to vector<16x1xf32>
    %4 = arith.divf %2, %3 : vector<16x1xf32>
    %5 = vector.broadcast %4 : vector<16x1xf32> to vector<16x128xf32>
    %6 = arith.subf %0, %5 : vector<16x128xf32>
    %7 = arith.mulf %6, %6 : vector<16x128xf32>
    %cst_2 = arith.constant dense<0.000000e+00> : vector<16xf32>
    %8 = vector.multi_reduction <add>, %7, %cst_2 [1] : vector<16x128xf32> to vector<16xf32>
    %9 = vector.shape_cast %8 : vector<16xf32> to vector<16x1xf32>
    %cst_3 = arith.constant 1.270000e+02 : f32
    %10 = vector.broadcast %cst_3 : f32 to vector<16x1xf32>
    %11 = arith.divf %9, %10 : vector<16x1xf32>
    %12 = math.sqrt %11 : vector<16x1xf32>
    %cst_4 = arith.constant 9.99999997E-7 : f32
    %13 = vector.broadcast %cst_4 : f32 to vector<16x1xf32>
    %14 = arith.addf %12, %13 : vector<16x1xf32>
    %cst_5 = arith.constant 1.000000e+00 : f32
    %15 = vector.broadcast %cst_5 : f32 to vector<16x1xf32>
    %16 = arith.divf %15, %14 : vector<16x1xf32>
    %17 = vector.broadcast %16 : vector<16x1xf32> to vector<16x128xf32>
    %18 = arith.mulf %6, %17 : vector<16x128xf32>
    %c0_6 = arith.constant 0 : index
    %c0_7 = arith.constant 0 : index
    %19 = vector.load %arg5[%c0_6, %c0_7] : memref<1x128xf32, #tpu.memory_space<vmem>>, vector<1x128xf32>
    %20 = vector.broadcast %19 : vector<1x128xf32> to vector<16x128xf32>
    %21 = arith.mulf %18, %20 : vector<16x128xf32>
    %c0_8 = arith.constant 0 : index
    %c0_9 = arith.constant 0 : index
    %22 = vector.load %arg6[%c0_8, %c0_9] : memref<1x128xf32, #tpu.memory_space<vmem>>, vector<1x128xf32>
    %23 = vector.broadcast %22 : vector<1x128xf32> to vector<16x128xf32>
    %24 = arith.addf %21, %23 : vector<16x128xf32>
    %25 = arith.truncf %24 : vector<16x128xf32> to vector<16x128xbf16>
    %c0_10 = arith.constant 0 : index
    %c0_11 = arith.constant 0 : index
    %26 = vector.load %arg3[%c0_10, %c0_11] : memref<128x128xbf16, #tpu.memory_space<vmem>>, vector<128x128xbf16>
    %cst_12 = arith.constant dense<0.000000e+00> : vector<16x128xf32>
    %27 = tpu.matmul %25, %26, %cst_12 {dimension_numbers = #tpu.dot_dimension_numbers<[1], [0], [0], [1], [0, 0, 1, 1], [], []>} : vector<16x128xbf16>, vector<128x128xbf16>, vector<16x128xf32> -> vector<16x128xf32>
    %c0_13 = arith.constant 0 : index
    %c0_14 = arith.constant 0 : index
    %28 = vector.load %arg4[%c0_13, %c0_14] : memref<1x128xf32, #tpu.memory_space<vmem>>, vector<1x128xf32>
    %29 = vector.broadcast %28 : vector<1x128xf32> to vector<16x128xf32>
    %30 = arith.addf %27, %29 : vector<16x128xf32>
    %31 = arith.addf %0, %30 : vector<16x128xf32>
    %c0_15 = arith.constant 0 : index
    %c0_16 = arith.constant 0 : index
    %32 = vector.load %arg7[%c0_15, %c0_16] : memref<16x128xf32, #tpu.memory_space<vmem>>, vector<16x128xf32>
    tpu.vector_store %arg7[%c0_15, %c0_16], %31 {strides = array<i32>} : memref<16x128xf32, #tpu.memory_space<vmem>>, vector<16x128xf32>,
    return
  }
  func.func @transform_0(%arg0: i32) -> i32 {
    %c0_i32 = arith.constant 0 : i32
    %c0_i32_0 = arith.constant 0 : i32
    return %c0_i32 : i32
  }
  func.func @transform_1(%arg0: i32) -> (i32, i32) {
    %c0_i32 = arith.constant 0 : i32
    %c0_i32_0 = arith.constant 0 : i32
    return %arg0, %c0_i32 : i32, i32
  }
  func.func @transform_2(%arg0: i32) -> (i32, i32) {
    %c0_i32 = arith.constant 0 : i32
    %c0_i32_0 = arith.constant 0 : i32
    %c0_i32_1 = arith.constant 0 : i32
    return %c0_i32, %c0_i32_0 : i32, i32
  }
  func.func @transform_3(%arg0: i32) -> (i32, i32) {
    %c0_i32 = arith.constant 0 : i32
    %c0_i32_0 = arith.constant 0 : i32
    %c0_i32_1 = arith.constant 0 : i32
    return %c0_i32, %c0_i32_0 : i32, i32
  }
  func.func @transform_4(%arg0: i32) -> (i32, i32) {
    %c0_i32 = arith.constant 0 : i32
    %c0_i32_0 = arith.constant 0 : i32
    %c0_i32_1 = arith.constant 0 : i32
    return %c0_i32, %c0_i32_0 : i32, i32
  }
  func.func @transform_5(%arg0: i32) -> (i32, i32) {
    %c0_i32 = arith.constant 0 : i32
    %c0_i32_0 = arith.constant 0 : i32
    %c0_i32_1 = arith.constant 0 : i32
    return %c0_i32, %c0_i32_0 : i32, i32
  }
  func.func @transform_6(%arg0: i32) -> (i32, i32) {
    %c0_i32 = arith.constant 0 : i32
    %c0_i32_0 = arith.constant 0 : i32
    return %arg0, %c0_i32 : i32, i32
  }
}

</mosaic_0001>

<bundles_post_ra>
// kernel: tpu_custom_call.1
= control target key start
LH: loop header
LB: loop body
LE: loop exit
PB: predicated region body
PF: predicated region fallthrough
CT: control target
= control target key end

     0   :  { %12 = vsyncpa [#allocation4], 0  ;;  %s491_s0 = inlined_call_operand.<no memory space> [shape: s32[1], index: 0, kind: input, shape index: {}]   ;;  %s492_s1 = inlined_call_operand.hbm [shape: f32[16,128], index: 1, kind: input, shape index: {}]   ;;  %s493_s2 = inlined_call_operand.hbm [shape: bf16[128,128], index: 2, kind: input, shape index: {}]   ;;  %s494_s3 = inlined_call_operand.vmem [shape: f32[1,128], index: 3, kind: input, shape index: {}]   ;;  %s495_s4 = inlined_call_operand.vmem [shape: f32[1,128], index: 4, kind: input, shape index: {}]   ;;  %s496_s5 = inlined_call_operand.vmem [shape: f32[1,128], index: 5, kind: input, shape index: {}]   ;;  %s497_s6 = inlined_call_operand.hbm [shape: f32[16,128], index: 6, kind: output, shape index: {}]  }
   0x1   :  { %13 = vsyncpa [#allocation7], 0 }
   0x2   :  { %14 = vsyncpa [#allocation5], 0  ;;  %s386_s0 = smov [#allocation3]   ;;  %s314_s24 = scalar_lea.hbm %s492_s1, 256 }
   0x3   :  { %s22_s21 = sshll.u32 %s386_s0, 4  ;;  %p315_p0 = scmp.ne.s32.totalorder %s492_s1, %s314_s24  ;;  %s23_s21 = int_to_ptr.vmem [resolvable:$true] %s22_s21 }
   0x4   :  { %p318_p1 = scmp.lt.u32.totalorder %s314_s24, %s492_s1 }
   0x6   :  { %p320_p2 = pnand %p318_p1, %p315_p0 }
   0x8   :  { %323 = shalt.err (!%p320_p2)
}
   0x9   :  { %s324_s29 = scalar_lea.vmem %s23_s21, 256  ;;  %p329_p4 = scmp.lt.s32.totalorder %s23_s21, %s23_s21 }
   0xa   :  { %p325_p3 = scmp.ne.s32.totalorder %s23_s21, %s324_s29  ;;  %p330_p5 = scmp.lt.s32.totalorder %s324_s29, %s324_s29 }
   0xc   :  { %p331_p6 = por %p330_p5, %p329_p4 }
   0xe   :  { %p332_p7 = pnand %p331_p6, %p325_p3 }
  0x10   :  { %335 = shalt.err (!%p332_p7)
}
  0x11   :  { %s387_s30 = smov 128   ;;  %s388_s7 = smov 8  }
  0x12   :  { %28 = dma.hbm_to_vmem [thread:$0]  %s492_s1, 256, %s23_s21, [#allocation4], %s387_s30, %s387_s30, %s388_s7  }
  0x13   :  { %s389_s10 = smov [#allocation6]   ;;  %s336_s14 = scalar_lea.hbm %s493_s2, 1024 }
  0x14   :  { %s34_s11 = sshll.u32 %s389_s10, 4  ;;  %p337_p8 = scmp.ne.s32.totalorder %s493_s2, %s336_s14  ;;  %s35_s11 = int_to_ptr.vmem [resolvable:$true] %s34_s11 }
  0x15   :  { %p340_p9 = scmp.lt.u32.totalorder %s336_s14, %s493_s2 }
  0x17   :  { %p342_p10 = pnand %p340_p9, %p337_p8 }
  0x19   :  { %345 = shalt.err (!%p342_p10)
}
  0x1a   :  { %s346_s19 = scalar_lea.vmem %s35_s11, 1024  ;;  %p351_p12 = scmp.lt.s32.totalorder %s35_s11, %s35_s11 }
  0x1b   :  { %p347_p11 = scmp.ne.s32.totalorder %s35_s11, %s346_s19  ;;  %p352_p13 = scmp.lt.s32.totalorder %s346_s19, %s346_s19 }
  0x1d   :  { %p353_p0 = por %p352_p13, %p351_p12 }
  0x1f   :  { %p354_p1 = pnand %p353_p0, %p347_p11 }
  0x21   :  { %357 = shalt.err (!%p354_p1)
}
  0x22   :  { %s390_s1 = smov 64   ;;  %s391_s20 = smov 4  }
  0x23   :  { %40 = dma.hbm_to_vmem [thread:$0]  %s493_s2, 1024, %s35_s11, [#allocation7], %s390_s1, %s390_s1, %s391_s20  }
  0x24   :  { %380 = dma.done.wait [#allocation4], 256  }
  0x25   :  { %381 = vsyncadd [#allocation4], 4294967040 }
  0x26   :  { %382 = dma.done.wait [#allocation7], 1024  }
  0x27   :  { %383 = vsyncadd [#allocation7], 4294966272  ;;  %v457_v0 = vld [vmem:[#allocation3] sm:$0xff]  ;;  %v459_v1 = vld [vmem:[#allocation3 + $0x8] sm:$0xff]  ;;  %v392_v11 = vmov 0.0   ;;  %vm393_vm0 = vmmov 0  }
  0x28   :  { %56 = vadd.xlane.f32.xlu0 %v457_v0  ;;  %v298_v10 = vld [vmem:[#allocation6] sm:$0xff]   ;;  %269 = vmatprep.subr.bf16.mxu0 %v392_v11  ;;  %v299_v12 = vld [vmem:[#allocation6 + $0x8] sm:$0xff]   ;;  %v300_v13 = vld [vmem:[#allocation6 + $0x10] sm:$0xff]  }
  0x29   :  { %270 = vmatpush3.bf16.msra.mxu0 %v298_v10  ;;  %v301_v14 = vld [vmem:[#allocation6 + $0x18] sm:$0xff]   ;;  %v302_v15 = vld [vmem:[#allocation6 + $0x20] sm:$0xff]   ;;  %285 = vmatprep.mubr.msk.bf16.mxu0 %vm393_vm0, %v392_v11  ;;  %v303_v16 = vld [vmem:[#allocation6 + $0x28] sm:$0xff]  }
  0x2a   :  { %271 = vmatprep.subr.bf16.mxu0 %v392_v11  ;;  %v304_v17 = vld [vmem:[#allocation6 + $0x30] sm:$0xff]   ;;  %v305_v18 = vld [vmem:[#allocation6 + $0x38] sm:$0xff]  }
  0x2b   :  { %v249_v37 = vld [vmem:[%s495_s4] ss:$0 sm:$0xff]  ;;  %s394_s4 = smov [#allocation8]  }
  0x2c   :  { %58 = vadd.xlane.f32.xlu0 %v459_v1  ;;  %v250_v41 = vld [vmem:[%s496_s5] ss:$0 sm:$0xff]  ;;  %s236_s27 = sshll.u32 %s394_s4, 4  ;;  %s237_s27 = int_to_ptr.vmem [resolvable:$true] %s236_s27 }
  0x2d   :  { %272 = vmatpush3.bf16.msra.mxu0 %v299_v12  ;;  %v251_v46 = vld [vmem:[%s494_s3] ss:$0 sm:$0xff]  ;;  %s358_s5 = scalar_lea.vmem %s237_s27, 256  ;;  %p363_p3 = scmp.lt.s32.totalorder %s237_s27, %s237_s27 }
  0x2e   :  { %273 = vmatprep.subr.bf16.mxu0 %v392_v11  ;;  %p359_p2 = scmp.ne.s32.totalorder %s237_s27, %s358_s5  ;;  %p364_p4 = scmp.lt.s32.totalorder %s358_s5, %s358_s5 }
  0x30   :  { %p365_p5 = por %p364_p4, %p363_p3 }
  0x31   :  { %274 = vmatpush3.bf16.msra.mxu0 %v300_v13 }
  0x32   :  { %275 = vmatprep.subr.bf16.mxu0 %v392_v11  ;;  %p366_p6 = pnand %p365_p5, %p359_p2 }
  0x35   :  { %276 = vmatpush3.bf16.msra.mxu0 %v301_v14 }
  0x36   :  { %277 = vmatprep.subr.bf16.mxu0 %v392_v11 }
  0x39   :  { %278 = vmatpush3.bf16.msra.mxu0 %v302_v15 }
  0x3a   :  { %279 = vmatprep.subr.bf16.mxu0 %v392_v11 }
  0x3d   :  { %280 = vmatpush3.bf16.msra.mxu0 %v303_v16 }
  0x3e   :  { %281 = vmatprep.subr.bf16.mxu0 %v392_v11 }
  0x41   :  { %282 = vmatpush3.bf16.msra.mxu0 %v304_v17 }
  0x42   :  { %283 = vmatprep.subr.bf16.mxu0 %v392_v11 }
  0x45   :  { %284 = vmatpush3.bf16.msra.mxu0 %v305_v18 }
  0xb5   :  { %v57_v2 = vpop.xlane.xlu0 %56 }
  0xb6   :  { %v61_v3 = vmul.f32 0.0078125, %v57_v2 }
  0xb8   :  { %v63_v4 = vsub.f32 %v457_v0, %v61_v3 }
  0xb9   :  { %v59_v5 = vpop.xlane.xlu0 %58 }
  0xba   :  { %v62_v6 = vmul.f32 0.0078125, %v59_v5  ;;  %v65_v7 = vmul.f32 %v63_v4, %v63_v4 }
  0xbc   :  { %v64_v8 = vsub.f32 %v459_v1, %v62_v6  ;;  %67 = vadd.xlane.f32.xlu1 %v65_v7 }
  0xbe   :  { %v66_v9 = vmul.f32 %v64_v8, %v64_v8 }
  0xc0   :  { %69 = vadd.xlane.f32.xlu1 %v66_v9 }
 0x149   :  { %v68_v19 = vpop.xlane.xlu1 %67 }
 0x14a   :  { %v72_v20 = vmul.f32 0.007874016, %v68_v19 }
 0x14c   :  { %306 = vrsqrt.f32 %v72_v20  ;;  %vm76_vm1 = vcmp.eq.f32.partialorder %v72_v20, inf  ;;  %v79_v25 = vand.u32 2147483648, %v72_v20  ;;  %vm78_vm2 = vcmp.eq.f32.partialorder %v72_v20, 0.0 }
 0x14d   :  { %v70_v21 = vpop.xlane.xlu1 %69 }
 0x14e   :  { %v73_v22 = vmul.f32 0.007874016, %v70_v21 }
 0x150   :  { %308 = vrsqrt.f32 %v73_v22  ;;  %vm83_vm3 = vcmp.eq.f32.partialorder %v73_v22, inf  ;;  %v86_v31 = vand.u32 2147483648, %v73_v22  ;;  %vm85_vm4 = vcmp.eq.f32.partialorder %v73_v22, 0.0 }
 0x156   :  { %v307_v23 = vpop.eup %306 }
 0x157   :  { %v75_v24 = vmul.f32 %v307_v23, %v72_v20 }
 0x159   :  { %v77_v26 = vsel %vm76_vm1, %v72_v20, %v75_v24 }
 0x15a   :  { %v309_v27 = vpop.eup %308  ;;  %v80_v28 = vsel %vm78_vm2, %v79_v25, %v77_v26 }
 0x15b   :  { %v88_v29 = vadd.f32 1e-06, %v80_v28  ;;  %v82_v30 = vmul.f32 %v309_v27, %v73_v22 }
 0x15d   :  { %v84_v32 = vsel %vm83_vm3, %v73_v22, %v82_v30  ;;  %310 = vrcp.f32 %v88_v29 }
 0x15e   :  { %v87_v33 = vsel %vm85_vm4, %v86_v31, %v84_v32 }
 0x15f   :  { %v89_v34 = vadd.f32 1e-06, %v87_v33 }
 0x161   :  { %312 = vrcp.f32 %v89_v34 }
 0x167   :  { %v311_v35 = vpop.eup %310 }
 0x168   :  { %v94_v36 = vmul.f32 %v311_v35, %v63_v4 }
 0x16a   :  { %v103_v40 = vmul.f32 %v249_v37, %v94_v36 }
 0x16b   :  { %v313_v38 = vpop.eup %312 }
 0x16c   :  { %v95_v39 = vmul.f32 %v313_v38, %v64_v8  ;;  %v112_v43 = vadd.f32 %v250_v41, %v103_v40 }
 0x16e   :  { %v104_v42 = vmul.f32 %v249_v37, %v95_v39 }
 0x170   :  { %v113_v44 = vadd.f32 %v250_v41, %v104_v42 }
 0x172   :  { %v114_v45 = vpack.c.bf16 %v113_v44, %v112_v43 }
 0x174   :  { %286 = vmatmul.mubr.bf16.vlgmr.msra.gmra.mrb[0].mxu0 %v114_v45 }
 0x247   :  { %v220_v47 = vpop.f32.mrb[0].mxu0 }
 0x248   :  { %v221_v48 = vadd.f32 %v251_v46, %v220_v47  ;;  %v287_v49 = vpop.f32.mrb[1].mxu0 }
 0x249   :  { %v223_v50 = vpop.f32.mrb[2].mxu0 }
 0x24a   :  { %v227_v51 = vadd.f32 %v221_v48, %v457_v0  ;;  %v224_v52 = vadd.f32 %v251_v46, %v223_v50  ;;  %v288_v53 = vpop.f32.mrb[3].mxu0 }
 0x24c   :  { %229 = vst [vmem:[#allocation8] sm:$0xff] %v227_v51  ;;  %v228_v54 = vadd.f32 %v224_v52, %v459_v1 }
 0x24e   :  { %230 = vst [vmem:[#allocation8 + $0x8] sm:$0xff] %v228_v54 }
 0x24f   :  { %369 = shalt.err (!%p366_p6)
}
 0x250   :  { %s370_s29 = scalar_lea.hbm %s497_s6, 256 }
 0x251   :  { %p371_p7 = scmp.ne.s32.totalorder %s497_s6, %s370_s29  ;;  %p374_p8 = scmp.lt.u32.totalorder %s370_s29, %s497_s6 }
 0x253   :  { %p376_p9 = pnand %p374_p8, %p371_p7 }
 0x255   :  { %379 = shalt.err (!%p376_p9)
}
 0x256   :  { %242 = dma.vmem_to_hbm [thread:$0]  %s237_s27, 256, %s497_s6, [#allocation5], %s387_s30, %s387_s30, %s388_s7  }
 0x257   :  { %384 = dma.done.wait [#allocation5], 256  }
 0x258   :  { %385 = vsyncadd [#allocation5], 4294967040 }
 0x259   :  { %246 = vsyncpa [#allocation4], 1 }
 0x25a   :  { %247 = vsyncpa [#allocation7], 1 }
 0x25b   :  { %248 = vsyncpa [#allocation5], 1 }

</bundles_post_ra>
